<compile_context>
chip_gen: v7x
topology: tpu7x:2x2x1
jax: 0.10.0
libtpu: 0.0.40
codegen_flags: <defaults>
</compile_context>

<pallas_src>
import math
import jax
import jax.numpy as jnp
from jax.experimental import pallas as pl
from jax.experimental.pallas import tpu as pltpu


def _round_up(x, m):
    return ((x + m - 1) // m) * m


# ------------------------- one-time probes (import time) --------------------


def _probe_buffered_single():
    """Probe once whether pipeline_mode=pl.Buffered(1) compiles, runs and is
    numerically correct on this jax version / backend."""
    if not hasattr(pl, "Buffered"):
        return False
    try:
        def k(x_ref, w_ref, o_ref):
            o_ref[...] = x_ref[...] + w_ref[...]

        f = pl.pallas_call(
            k,
            out_shape=jax.ShapeDtypeStruct((16, 128), jnp.float32),
            grid_spec=pltpu.PrefetchScalarGridSpec(
                num_scalar_prefetch=0,
                grid=(2,),
                in_specs=[
                    pl.BlockSpec((8, 128), lambda i: (i, 0)),
                    pl.BlockSpec((8, 128), lambda i: (0, 0),
                                 pipeline_mode=pl.Buffered(1)),
                ],
                out_specs=pl.BlockSpec((8, 128), lambda i: (i, 0)),
            ),
        )
        a = jnp.arange(16 * 128, dtype=jnp.float32).reshape(16, 128)
        w = jnp.ones((8, 128), jnp.float32)
        out = jax.jit(f)(a, w)
        ref = a + jnp.concatenate([w, w], axis=0)
        return bool(jnp.allclose(out, ref))
    except Exception:
        return False


def _vmem_budget_bytes():
    """~85% of physical per-core VMEM; conservative 64 MiB (v7x) fallback."""
    cap = None
    try:
        info = pltpu.get_tpu_info()
        cap = getattr(info, "vmem_capacity_bytes", None)
    except Exception:
        cap = None
    if not cap or cap <= 0:
        cap = 64 << 20
    return int(cap * 0.85)


_BUFFERED_OK = _probe_buffered_single()
_VMEM_BUDGET = _vmem_budget_bytes()


# ----------------------------- kernel body ----------------------------------


def _mlp_kernel(x_ref, w1_ref, b1_ref, w2_ref, b2_ref, o_ref, acc_ref):
    """One (batch-tile, hidden-slab) grid step.

    Grid = (batch tiles, hidden slabs); the hidden axis is the inner
    ("arbitrary") axis and accumulates fc2 partial products into an f32 VMEM
    scratch (standard P3 accumulator pattern). With a single hidden slab this
    degenerates to the fully-fused resident-weight kernel.
    """
    h_idx = pl.program_id(1)

    @pl.when(h_idx == 0)
    def _():
        acc_ref[...] = jnp.zeros_like(acc_ref)

    # fc1 on the MXU: cast the f32 x tile to bf16 in-kernel (saves a host-side
    # HBM pass), accumulate in f32.
    xb = x_ref[...].astype(jnp.bfloat16)
    h = jnp.dot(xb, w1_ref[...], preferred_element_type=jnp.float32)
    # Bias + ReLU stay f32 on the VPU (v5e has no bf16 VPU).
    h = jnp.maximum(h + b1_ref[...], 0.0)
    # fc2 partial product for this hidden slab, accumulated in f32.
    acc_ref[...] += jnp.dot(h.astype(jnp.bfloat16), w2_ref[...],
                            preferred_element_type=jnp.float32)

    @pl.when(h_idx == pl.num_programs(1) - 1)
    def _():
        o_ref[...] = (acc_ref[...] + b2_ref[...]).astype(o_ref.dtype)


# ----------------------------- host-side glue --------------------------------


def prepare_params(w1, b1, w2, b2, *, compute_dtype=jnp.bfloat16):
    """Transpose / zero-pad / cast nn.Linear-layout params ONCE (not per call).

    w1: [hid, in], b1: [hid], w2: [out, hid], b2: [out].
    hid is padded to a multiple of 256 when >= 256 (v6e/v7x 2x256x256 MXU),
    else 128; out is padded to 128 only (keeps output HBM writeback minimal).
    Zero padding is exact: padded hidden columns are 0 after ReLU and the
    corresponding W2 rows are 0.
    """
    hid, in_dim = w1.shape
    out_dim = w2.shape[0]
    hid_pad = 256 if hid >= 256 else 128
    hid_p = _round_up(hid, hid_pad)
    out_p = _round_up(out_dim, 128)

    w1_t = jnp.zeros((in_dim, hid_p), compute_dtype)
    w1_t = w1_t.at[:, :hid].set(w1.T.astype(compute_dtype))
    w2_t = jnp.zeros((hid_p, out_p), compute_dtype)
    w2_t = w2_t.at[:hid, :out_dim].set(w2.T.astype(compute_dtype))
    b1_p = jnp.zeros((1, hid_p), jnp.float32).at[0, :hid].set(b1.astype(jnp.float32))
    b2_p = jnp.zeros((1, out_p), jnp.float32).at[0, :out_dim].set(b2.astype(jnp.float32))
    return (w1_t, b1_p, w2_t, b2_p, out_dim)


def _weight_bytes(in_dim, tile_h, out_p, bufs):
    # bf16 weight slabs + f32 bias slabs, per buffer copy.
    return bufs * ((in_dim + out_p) * tile_h * 2 + (tile_h + out_p) * 4)


def _choose_tile_h(hid_p, in_dim, out_p, budget):
    """Largest 128-multiple divisor of hid_p whose weight slabs fit in ~60% of
    the VMEM budget; hid_p itself (fully resident weights) when possible."""
    res_bufs = 1 if _BUFFERED_OK else 2
    if _weight_bytes(in_dim, hid_p, out_p, res_bufs) <= 0.6 * budget:
        return hid_p
    m = hid_p // 128
    for d in range(m - 1, 0, -1):
        if m % d:
            continue
        th = 128 * d
        if _weight_bytes(in_dim, th, out_p, 2) <= 0.6 * budget:
            return th
    return 128


def _choose_tile_b(B, in_dim, tile_h, out_p, out_bytes, budget, w_bytes):
    """Batch tile from the VMEM budget (includes the fc1 intermediate), with at
    least 2 grid steps so both v7x TensorCores get work."""
    row = (2 * in_dim * 4          # x tile (f32), double-buffered
           + in_dim * 2            # in-kernel bf16 cast of x
           + 2 * out_p * out_bytes # out tiles, double-buffered
           + out_p * 4             # f32 accumulator scratch
           + tile_h * 6)           # fc1 intermediate: f32 h + bf16 recast
    avail = max(budget - w_bytes, budget // 8)
    tb = max(16, min(int(avail // max(row, 1)), 2048))
    if B <= 16:
        return _round_up(B, 8)
    two_step = _round_up(pl.cdiv(B, 2), 16)
    if tb >= two_step:
        return two_step            # exactly 2 grid steps -> even megacore split
    if tb >= 128:
        return (tb // 128) * 128   # many steps: 128-row multiples
    return max(16, (tb // 16) * 16)


def _build_mlp_call(*, B, in_dim, hid_p, out_p, tile_b, tile_h, out_dtype,
                    vmem_limit):
    n_h = hid_p // tile_h
    n_b = pl.cdiv(B, tile_b)
    # Constant-index (resident) weight slabs are single-buffered when supported;
    # slabs that cycle over the hidden axis keep default double-buffering.
    const_w = _BUFFERED_OK and n_h == 1
    wmode = dict(pipeline_mode=pl.Buffered(1)) if const_w else {}
    cmode = dict(pipeline_mode=pl.Buffered(1)) if _BUFFERED_OK else {}

    return pl.pallas_call(
        _mlp_kernel,
        out_shape=jax.ShapeDtypeStruct((B, out_p), out_dtype),
        grid_spec=pltpu.PrefetchScalarGridSpec(
            num_scalar_prefetch=0,
            grid=(n_b, n_h),
            in_specs=[
                pl.BlockSpec((tile_b, in_dim), lambda i, h: (i, 0)),           # x tile (f32)
                pl.BlockSpec((in_dim, tile_h), lambda i, h: (0, h), **wmode),  # W1^T slab
                pl.BlockSpec((1, tile_h), lambda i, h: (0, h), **wmode),       # b1 slab
                pl.BlockSpec((tile_h, out_p), lambda i, h: (h, 0), **wmode),   # W2^T slab
                pl.BlockSpec((1, out_p), lambda i, h: (0, 0), **cmode),        # b2
            ],
            out_specs=pl.BlockSpec((tile_b, out_p), lambda i, h: (i, 0)),
            scratch_shapes=[pltpu.VMEM((tile_b, out_p), jnp.float32)],
        ),
        compiler_params=pltpu.CompilerParams(
            dimension_semantics=("parallel", "arbitrary"),
            vmem_limit_bytes=int(vmem_limit),
        ),
    )


def mlp_forward(x, params, *, tile_b=None, tile_h=None, out_dtype=jnp.float32):
    """x: [B, in] (f32 or bf16); params from prepare_params. Returns [B, out]."""
    w1_t, b1_p, w2_t, b2_p, out_dim = params
    B, in_dim = x.shape
    assert in_dim == w1_t.shape[0]
    hid_p, out_p = w2_t.shape

    budget = _VMEM_BUDGET
    out_bytes = jnp.dtype(out_dtype).itemsize

    if tile_h is None:
        tile_h = _choose_tile_h(hid_p, in_dim, out_p, budget)
    assert hid_p % tile_h == 0 and tile_h % 128 == 0
    n_h = hid_p // tile_h
    w_bufs = 1 if (_BUFFERED_OK and n_h == 1) else 2
    w_bytes = _weight_bytes(in_dim, tile_h, out_p, w_bufs)

    if tile_b is None:
        tile_b = _choose_tile_b(B, in_dim, tile_h, out_p, out_bytes, budget,
                                w_bytes)
    else:
        tile_b = max(8, min(_round_up(tile_b, 8), _round_up(B, 8)))

    # VMEM estimate INCLUDING the fc1 intermediate and the accumulator scratch.
    est = (2 * tile_b * in_dim * 4
           + tile_b * in_dim * 2
           + 2 * tile_b * out_p * out_bytes
           + tile_b * out_p * 4
           + tile_b * tile_h * 6
           + w_bytes)
    vmem_limit = max(min(int(1.3 * est), budget), min(32 << 20, budget))

    call = _build_mlp_call(B=B, in_dim=in_dim, hid_p=hid_p, out_p=out_p,
                           tile_b=tile_b, tile_h=tile_h, out_dtype=out_dtype,
                           vmem_limit=vmem_limit)
    out = call(x, w1_t, b1_p, w2_t, b2_p)
    if out_p != out_dim:
        out = out[:, :out_dim]   # feature-dim slice only; no batch-dim slice
    return out


def init_params(key, input_size, hidden_size, output_size):
    # Mirrors the PyTorch module's init distribution:
    #   fc1.weight ~ N(0, sqrt(2/input_size)),  fc1.bias = 0
    #   fc2.weight ~ N(0, sqrt(2/hidden_size)), fc2.bias = 0
    # TODO(synk): exact torch.manual_seed(0) weight values are not reproducible
    # with JAX PRNG; only the distribution is matched.
    k1, k2 = jax.random.split(key)
    w1 = jax.random.normal(k1, (hidden_size, input_size), jnp.float32) * math.sqrt(
        2.0 / input_size)
    b1 = jnp.zeros((hidden_size,), jnp.float32)
    w2 = jax.random.normal(k2, (output_size, hidden_size), jnp.float32) * math.sqrt(
        2.0 / hidden_size)
    b2 = jnp.zeros((output_size,), jnp.float32)
    return w1, b1, w2, b2


def _reference_checks(x, w1, b1, w2, b2, out):
    # Reference 1: exact module semantics in f32 (loose tol: kernel uses bf16
    # matmul operands with f32 accumulation).
    ref_f32 = jnp.maximum(x @ w1.T + b1, 0.0) @ w2.T + b2
    assert jnp.allclose(out, ref_f32, atol=2.5e-1, rtol=1e-1)
    # Reference 2: emulate the kernel's bf16-operand / f32-accumulate path.
    xb = x.astype(jnp.bfloat16).astype(jnp.float32)
    w1b = w1.astype(jnp.bfloat16).astype(jnp.float32)
    w2b = w2.astype(jnp.bfloat16).astype(jnp.float32)
    h = jnp.maximum(xb @ w1b.T + b1, 0.0)
    h = h.astype(jnp.bfloat16).astype(jnp.float32)
    ref_bf16 = h @ w2b.T + b2
    assert jnp.allclose(out, ref_bf16, atol=5e-3, rtol=5e-3)


if __name__ == "__main__":
    key = jax.random.PRNGKey(0)
    kx, kp, kx2, kp2 = jax.random.split(key, 4)

    # --- Test 1: resident-weight path, partial last batch tile (no padding) ---
    batch, input_size, hidden_size, output_size = 260, 32, 64, 16
    x = jax.random.normal(kx, (batch, input_size), jnp.float32)
    w1, b1, w2, b2 = init_params(kp, input_size, hidden_size, output_size)
    params = prepare_params(w1, b1, w2, b2)

    out = jax.block_until_ready(mlp_forward(x, params))
    assert out.shape == (batch, output_size)
    _reference_checks(x, w1, b1, w2, b2, out)

    # --- Test 2: hidden-tiled accumulator path (forced tile_h < hid_p) --------
    batch2, input2, hidden2, output2 = 64, 32, 256, 16
    x2 = jax.random.normal(kx2, (batch2, input2), jnp.float32)
    w1b_, b1b_, w2b_, b2b_ = init_params(kp2, input2, hidden2, output2)
    params2 = prepare_params(w1b_, b1b_, w2b_, b2b_)

    out2 = jax.block_until_ready(
        mlp_forward(x2, params2, tile_b=32, tile_h=128))   # grid (2, 2)
    assert out2.shape == (batch2, output2)
    _reference_checks(x2, w1b_, b1b_, w2b_, b2b_, out2)

    print("KERNEL_OK")
</pallas_src>

<mosaic_0001>
module attributes {stable_mosaic.version = 11 : i64} {
  func.func @k(%arg0: i32, %arg1: memref<8x128xf32, #tpu.memory_space<vmem>>, %arg2: memref<8x128xf32, #tpu.memory_space<vmem>>, %arg3: memref<8x128xf32, #tpu.memory_space<vmem>>) attributes {dimension_semantics = [#tpu.dimension_semantics<arbitrary>], iteration_bounds = array<i64: 2>, scalar_prefetch = 0 : i64, scratch_operands = 0 : i64, tpu.core_type = #tpu.core_type<tc>, window_params = [{transform_indices = @transform_0, window_bounds = array<i64: 8, 128>}, {pipeline_mode = #tpu.pipeline_mode<synchronous>, transform_indices = @transform_1, window_bounds = array<i64: 8, 128>}, {transform_indices = @transform_2, window_bounds = array<i64: 8, 128>}]} {
    %c0 = arith.constant 0 : index
    %c0_0 = arith.constant 0 : index
    %0 = vector.load %arg1[%c0, %c0_0] : memref<8x128xf32, #tpu.memory_space<vmem>>, vector<8x128xf32>
    %c0_1 = arith.constant 0 : index
    %c0_2 = arith.constant 0 : index
    %1 = vector.load %arg2[%c0_1, %c0_2] : memref<8x128xf32, #tpu.memory_space<vmem>>, vector<8x128xf32>
    %2 = arith.addf %0, %1 : vector<8x128xf32>
    %c0_3 = arith.constant 0 : index
    %c0_4 = arith.constant 0 : index
    %3 = vector.load %arg3[%c0_3, %c0_4] : memref<8x128xf32, #tpu.memory_space<vmem>>, vector<8x128xf32>
    tpu.vector_store %arg3[%c0_3, %c0_4], %2 {strides = array<i32>} : memref<8x128xf32, #tpu.memory_space<vmem>>, vector<8x128xf32>,
    return
  }
  func.func @transform_0(%arg0: i32) -> (i32, i32) {
    %c0_i32 = arith.constant 0 : i32
    %c0_i32_0 = arith.constant 0 : i32
    return %arg0, %c0_i32 : i32, i32
  }
  func.func @transform_1(%arg0: i32) -> (i32, i32) {
    %c0_i32 = arith.constant 0 : i32
    %c0_i32_0 = arith.constant 0 : i32
    %c0_i32_1 = arith.constant 0 : i32
    return %c0_i32, %c0_i32_0 : i32, i32
  }
  func.func @transform_2(%arg0: i32) -> (i32, i32) {
    %c0_i32 = arith.constant 0 : i32
    %c0_i32_0 = arith.constant 0 : i32
    return %arg0, %c0_i32 : i32, i32
  }
}

module attributes {stable_mosaic.version = 11 : i64} {
  func.func @_mlp_kernel(%arg0: i32, %arg1: i32, %arg2: memref<144x32xf32, #tpu.memory_space<vmem>>, %arg3: memref<32x128xbf16, #tpu.memory_space<vmem>>, %arg4: memref<1x128xf32, #tpu.memory_space<vmem>>, %arg5: memref<128x128xbf16, #tpu.memory_space<vmem>>, %arg6: memref<1x128xf32, #tpu.memory_space<vmem>>, %arg7: memref<144x128xf32, #tpu.memory_space<vmem>>, %arg8: memref<144x128xf32, #tpu.memory_space<vmem>>) attributes {dimension_semantics = [#tpu.dimension_semantics<parallel>, #tpu.dimension_semantics<arbitrary>], iteration_bounds = array<i64: 2, 1>, scalar_prefetch = 0 : i64, scratch_operands = 1 : i64, tpu.core_type = #tpu.core_type<tc>, window_params = [{transform_indices = @transform_0, window_bounds = array<i64: 144, 32>}, {transform_indices = @transform_1, window_bounds = array<i64: 32, 128>}, {transform_indices = @transform_2, window_bounds = array<i64: 1, 128>}, {transform_indices = @transform_3, window_bounds = array<i64: 128, 128>}, {pipeline_mode = #tpu.pipeline_mode<synchronous>, transform_indices = @transform_4, window_bounds = array<i64: 1, 128>}, {transform_indices = @transform_5, window_bounds = array<i64: 144, 128>}]} {
    %c0_i32 = arith.constant 0 : i32
    %0 = arith.cmpi eq, %arg1, %c0_i32 : i32
    %1 = arith.extui %0 : i1 to i32
    %c0_i32_0 = arith.constant 0 : i32
    %2 = arith.cmpi ne, %1, %c0_i32_0 : i32
    scf.if %2 {
      %cst_16 = arith.constant 0.000000e+00 : f32
      %21 = vector.broadcast %cst_16 : f32 to vector<144x128xf32>
      %c0_17 = arith.constant 0 : index
      %c0_18 = arith.constant 0 : index
      %22 = vector.load %arg8[%c0_17, %c0_18] : memref<144x128xf32, #tpu.memory_space<vmem>>, vector<144x128xf32>
      tpu.vector_store %arg8[%c0_17, %c0_18], %21 {strides = array<i32>} : memref<144x128xf32, #tpu.memory_space<vmem>>, vector<144x128xf32>,
    } else {
    }
    %c0 = arith.constant 0 : index
    %c0_1 = arith.constant 0 : index
    %3 = vector.load %arg2[%c0, %c0_1] : memref<144x32xf32, #tpu.memory_space<vmem>>, vector<144x32xf32>
    %4 = arith.truncf %3 : vector<144x32xf32> to vector<144x32xbf16>
    %c0_2 = arith.constant 0 : index
    %c0_3 = arith.constant 0 : index
    %5 = vector.load %arg3[%c0_2, %c0_3] : memref<32x128xbf16, #tpu.memory_space<vmem>>, vector<32x128xbf16>
    %cst = arith.constant dense<0.000000e+00> : vector<144x128xf32>
    %6 = tpu.matmul %4, %5, %cst {dimension_numbers = #tpu.dot_dimension_numbers<[1], [0], [0], [1], [0, 0, 1, 1], [], []>} : vector<144x32xbf16>, vector<32x128xbf16>, vector<144x128xf32> -> vector<144x128xf32>
    %c0_4 = arith.constant 0 : index
    %c0_5 = arith.constant 0 : index
    %7 = vector.load %arg4[%c0_4, %c0_5] : memref<1x128xf32, #tpu.memory_space<vmem>>, vector<1x128xf32>
    %8 = vector.broadcast %7 : vector<1x128xf32> to vector<144x128xf32>
    %9 = arith.addf %6, %8 : vector<144x128xf32>
    %cst_6 = arith.constant 0.000000e+00 : f32
    %10 = vector.broadcast %cst_6 : f32 to vector<144x128xf32>
    %11 = arith.maximumf %9, %10 : vector<144x128xf32>
    %c0_7 = arith.constant 0 : index
    %c0_8 = arith.constant 0 : index
    %12 = vector.load %arg8[%c0_7, %c0_8] : memref<144x128xf32, #tpu.memory_space<vmem>>, vector<144x128xf32>
    %13 = arith.truncf %11 : vector<144x128xf32> to vector<144x128xbf16>
    %c0_9 = arith.constant 0 : index
    %c0_10 = arith.constant 0 : index
    %14 = vector.load %arg5[%c0_9, %c0_10] : memref<128x128xbf16, #tpu.memory_space<vmem>>, vector<128x128xbf16>
    %cst_11 = arith.constant dense<0.000000e+00> : vector<144x128xf32>
    %15 = tpu.matmul %13, %14, %cst_11 {dimension_numbers = #tpu.dot_dimension_numbers<[1], [0], [0], [1], [0, 0, 1, 1], [], []>} : vector<144x128xbf16>, vector<128x128xbf16>, vector<144x128xf32> -> vector<144x128xf32>
    %16 = arith.addf %12, %15 : vector<144x128xf32>
    %c0_12 = arith.constant 0 : index
    %c0_13 = arith.constant 0 : index
    %17 = vector.load %arg8[%c0_12, %c0_13] : memref<144x128xf32, #tpu.memory_space<vmem>>, vector<144x128xf32>
    tpu.vector_store %arg8[%c0_12, %c0_13], %16 {strides = array<i32>} : memref<144x128xf32, #tpu.memory_space<vmem>>, vector<144x128xf32>,
    %c0_i32_14 = arith.constant 0 : i32
    %18 = arith.cmpi eq, %arg1, %c0_i32_14 : i32
    %19 = arith.extui %18 : i1 to i32
    %c0_i32_15 = arith.constant 0 : i32
    %20 = arith.cmpi ne, %19, %c0_i32_15 : i32
    scf.if %20 {
      %c0_16 = arith.constant 0 : index
      %c0_17 = arith.constant 0 : index
      %21 = vector.load %arg8[%c0_16, %c0_17] : memref<144x128xf32, #tpu.memory_space<vmem>>, vector<144x128xf32>
      %c0_18 = arith.constant 0 : index
      %c0_19 = arith.constant 0 : index
      %22 = vector.load %arg6[%c0_18, %c0_19] : memref<1x128xf32, #tpu.memory_space<vmem>>, vector<1x128xf32>
      %23 = vector.broadcast %22 : vector<1x128xf32> to vector<144x128xf32>
      %24 = arith.addf %21, %23 : vector<144x128xf32>
      %c0_20 = arith.constant 0 : index
      %c0_21 = arith.constant 0 : index
      %25 = vector.load %arg7[%c0_20, %c0_21] : memref<144x128xf32, #tpu.memory_space<vmem>>, vector<144x128xf32>
      tpu.vector_store %arg7[%c0_20, %c0_21], %24 {strides = array<i32>} : memref<144x128xf32, #tpu.memory_space<vmem>>, vector<144x128xf32>,
    } else {
    }
    return
  }
  func.func @transform_0(%arg0: i32, %arg1: i32) -> (i32, i32) {
    %c0_i32 = arith.constant 0 : i32
    %c0_i32_0 = arith.constant 0 : i32
    return %arg0, %c0_i32 : i32, i32
  }
  func.func @transform_1(%arg0: i32, %arg1: i32) -> (i32, i32) {
    %c0_i32 = arith.constant 0 : i32
    %c0_i32_0 = arith.constant 0 : i32
    return %c0_i32, %arg1 : i32, i32
  }
  func.func @transform_2(%arg0: i32, %arg1: i32) -> (i32, i32) {
    %c0_i32 = arith.constant 0 : i32
    %c0_i32_0 = arith.constant 0 : i32
    return %c0_i32, %arg1 : i32, i32
  }
  func.func @transform_3(%arg0: i32, %arg1: i32) -> (i32, i32) {
    %c0_i32 = arith.constant 0 : i32
    %c0_i32_0 = arith.constant 0 : i32
    return %arg1, %c0_i32 : i32, i32
  }
  func.func @transform_4(%arg0: i32, %arg1: i32) -> (i32, i32) {
    %c0_i32 = arith.constant 0 : i32
    %c0_i32_0 = arith.constant 0 : i32
    %c0_i32_1 = arith.constant 0 : i32
    return %c0_i32, %c0_i32_0 : i32, i32
  }
  func.func @transform_5(%arg0: i32, %arg1: i32) -> (i32, i32) {
    %c0_i32 = arith.constant 0 : i32
    %c0_i32_0 = arith.constant 0 : i32
    return %arg0, %c0_i32 : i32, i32
  }
}

</mosaic_0001>

<bundles_post_ra>
// kernel: tpu_custom_call.1
= control target key start
LH: loop header
LB: loop body
LE: loop exit
PB: predicated region body
PF: predicated region fallthrough
CT: control target
= control target key end

     0   :  { %7 = vsyncpa [#allocation3], 0  ;;  %s690_s0 = inlined_call_operand.hbm [shape: f32[16,128], index: 0, kind: input, shape index: {}]   ;;  %s691_s1 = inlined_call_operand.hbm [shape: f32[8,128], index: 1, kind: input, shape index: {}]   ;;  %s692_s2 = inlined_call_operand.hbm [shape: f32[16,128], index: 2, kind: output, shape index: {}]  }
   0x1   :  { %9 = vsyncpa [#allocation3 + $0x1], 0 }
   0x2   :  { %10 = vsyncpa [#allocation6], 0 }
   0x3   :  { %11 = vsyncpa [#allocation4], 0 }
   0x4   :  { %13 = vsyncpa [#allocation4 + $0x1], 0  ;;  %s489_s9 = smov 0   ;;  %s491_s10 = smov 0  }
   0x5   :  { %s493_s11 = smov 0   ;;  %s495_s12 = smov 0  }
   0x6 LB: > { %s510_s13 = sadd.s32 4294967295, %s469_s12   ;;  %s270_s14 = sadd.s32 4294967294, %s469_s12   ;;  %s469_s12 = sphi %s495_s12, %s716_s12   ;;  %s465_s11 = sphi %s493_s11, %s715_s11   ;;  %s461_s10 = sphi %s491_s10, %s714_s10   ;;  %s457_s9 = sphi %s489_s9, %s713_s9  }
   0x7   : > { %p39_p0 = scmp.ne.s32.totalorder %s461_s10, %s457_s9  ;;  %p693_p1 = scmp.eq.s32.totalorder %s510_s13, 0 }
   0x8   : > { %p90_p3 = scmp.eq.s32.totalorder %s270_s14, 1  ;;  %p271_p5 = scmp.ge.s32.totalorder %s469_s12, 1 }
   0x9   : > { %p519_p4 = por %p693_p1, %p39_p0  ;;  %p97_p7 = scmp.lt.s32.totalorder %s469_s12, 3 }
   0xa   : > { %p524_p6 = por %p90_p3, %p39_p0  ;;  %s471_s18 = smov [#allocation5]  }
   0xb   : > { %s696_s15 = scalar_select %p519_p4, 1, 0 }
   0xc   : > { %s697_s16 = scalar_select %p524_p6, 1, 0 }
   0xd   : > { %p529_p8 = pnand %p271_p5, %p97_p7  ;;  %s110_s19 = sshll.u32 %s471_s18, 4  ;;  %s111_s19 = int_to_ptr.vmem [resolvable:$true] %s110_s19 }
   0xe   : > { %s537_s20 = sadd.s32 1, %s469_s12   ;;  %s26_s24 = sadd.s32 1, %s465_s11 }
   0xf   : > { %s698_s17 = scalar_select %p529_p8, 1, 0 }
  0x10   : > { %p292_p10 = pneg %p529_p8  ;;  %s23_s22 = ssub.s32 %s469_s12, %s537_s20 }
  0x11   : > { %p547_p12 = scmp.eq.s32.totalorder %s23_s22, 0  ;;  %s341_s27 = scalar_lea.hbm %s691_s1, 128 }
  0x12   : > { %p541_p11 = pnand %p292_p10, %p693_p1  ;;  %p342_p0 = scmp.ne.s32.totalorder %s691_s1, %s341_s27 }
  0x13   : > { %s700_s23 = scalar_select %p547_p12, 1, 0 }
  0x14   : > { %p343_p3 = pneg %p541_p11  ;;  %p348_p10 = scmp.lt.u32.totalorder %s341_s27, %s691_s1 }
  0x16   : > { %p344_p5 = pnand %p343_p3, %p342_p0 }
  0x18   : > { %p345_p7 = pneg %p344_p5 }
  0x1a   : > { %p350_p9 = pnand %p348_p10, %p345_p7 }
  0x1c   : > { %353 = shalt.err (!%p350_p9)
}
  0x1d   : > { %s354_s4 = scalar_lea.vmem %s111_s19, 128  ;;  %p362_p6 = scmp.lt.s32.totalorder %s111_s19, %s111_s19 }
  0x1e   : > { %p355_p1 = scmp.ne.s32.totalorder %s111_s19, %s354_s4  ;;  %p363_p4 = scmp.lt.s32.totalorder %s354_s4, %s354_s4 }
  0x20   : > { %p357_p2 = pnand %p355_p1, %p343_p3  ;;  %p364_p8 = por %p363_p4, %p362_p6 }
  0x22   : > { %p358_p13 = pneg %p357_p2 }
  0x24   : > { %p365_p12 = pnand %p364_p8, %p358_p13 }
  0x26   : > { %368 = shalt.err (!%p365_p12)
}
  0x27   : > { %295 = dma.hbm_to_vmem [thread:$0]  (!%p541_p11), %s691_s1, 128, %s111_s19, [#allocation6]  }
  0x28   : > { %p701_p1 = scmp.ne.s32.totalorder %s700_s23, 0  ;;  %p34_p2 = scmp.eq.s32.totalorder %s469_s12, 0 }
  0x29   : > { %p702_p4 = scmp.ne.s32.totalorder %s465_s11, %s461_s10  ;;  %p703_p6 = scmp.eq.s32.totalorder %s510_s13, 1 }
  0x2a   : > { %s573_s7 = scalar_select %p701_p1, %s465_s11, %s26_s24  }
  0x2b   : > { %p581_p8 = por %p703_p6, %p702_p4  ;;  %p305_p9 = scmp.lt.s32.totalorder %s469_s12, 2 }
  0x2c   : > { %s121_s14 = sand.u32 1, %s465_s11   ;;  %p705_p12 = pmov %p702_p4 }
  0x2d   : > { %s274_s18 = sshll.u32 %s121_s14, 3  ;;  %s275_s21 = sshll.u32 %s469_s12, 7 }
  0x2e   : > { %p35_p13 = por %p34_p2, %p705_p12  ;;  %s594_s19 = scalar_lea.hbm %s690_s0, %s275_s21 }
  0x2f   : > { %s125_s23 = scalar_lea.vmem [#allocation2], %s274_s18  ;;  %s122_s27 = scalar_lea.sflag [#allocation3], %s121_s14 }
  0x30   : > { %s132_s24 = sshll.u32 %s125_s23, 4  ;;  %p596_p11 = pnand %p305_p9, %p35_p13  ;;  %s600_s24 = int_to_ptr.vmem [resolvable:$true] %s132_s24 }
  0x31   : > { %s369_s28 = scalar_lea.hbm %s594_s19, 128  ;;  %s374_s3 = scalar_lea.hbm %s690_s0, 256 }
  0x32   : > { %p370_p0 = scmp.ne.s32.totalorder %s594_s19, %s369_s28  ;;  %p371_p3 = pneg %p596_p11 }
  0x33   : > { %p375_p10 = scmp.lt.u32.totalorder %s594_s19, %s690_s0  ;;  %p376_p1 = scmp.lt.u32.totalorder %s374_s3, %s369_s28 }
  0x34   : > { %p372_p5 = pnand %p371_p3, %p370_p0  ;;  %p378_p4 = scmp.lt.u32.totalorder %s369_s28, %s594_s19 }
  0x35   : > { %p377_p2 = por %p376_p1, %p375_p10 }
  0x36   : > { %p373_p7 = pneg %p372_p5 }
  0x37   : > { %p379_p6 = por %p378_p4, %p377_p2 }
  0x39   : > { %p380_p9 = pnand %p379_p6, %p373_p7 }
  0x3b   : > { %383 = shalt.err (!%p380_p9)
}
  0x3c   : > { %s384_s6 = scalar_lea.vmem %s600_s24, 128  ;;  %s472_s14 = smov [#allocation2]  }
  0x3d   : > { %p385_p12 = scmp.ne.s32.totalorder %s600_s24, %s384_s6  ;;  %s389_s18 = sshll.u32 %s472_s14, 4  ;;  %s390_s18 = int_to_ptr.vmem [resolvable:$false] %s389_s18 }
  0x3e   : > { %s391_s21 = scalar_lea.vmem %s390_s18, 256  ;;  %p392_p5 = scmp.lt.s32.totalorder %s600_s24, %s390_s18 }
  0x3f   : > { %p387_p13 = pnand %p385_p12, %p371_p3  ;;  %p393_p10 = scmp.lt.s32.totalorder %s391_s21, %s384_s6 }
  0x41   : > { %p388_p0 = pneg %p387_p13  ;;  %p394_p1 = por %p393_p10, %p392_p5 }
  0x43   : > { %p395_p2 = pnand %p394_p1, %p388_p0 }
  0x45   : > { %398 = shalt.err (!%p395_p2)
}
  0x46   : > { %299 = dma.hbm_to_vmem [thread:$0]  (!%p596_p11), %s594_s19, 128, %s600_s24, %s122_s27  }
  0x47   : > { %p707_p7 = scmp.ne.s32.totalorder %s698_s17, 0 }
  0x48   : > { %s630_s22 = sand.u32 (!%p707_p7), 1, %s461_s10   ;;  %p708_p3 = scmp.ne.s32.totalorder (!%p707_p7), %s696_s15, 0 }
  0x49   : > { %141 = sbr.rel (%p707_p7) target bundleno = 109 (0x6d), region = 28  ;;  %s277_s25 = sshll.u32 (!%p707_p7), %s630_s22, 3 }
  0x4a   : > { %s144_s23 = scalar_lea.sflag (!%p707_p7), [#allocation3], %s630_s22  ;;  %s147_s28 = scalar_lea.vmem (!%p707_p7), [#allocation2], %s277_s25 }
  0x50   : > { %444 = dma.done.wait (%p708_p3), %s144_s23, 128  }
  0x51   : > { %446 = vsyncadd (%p708_p3), %s144_s23, 4294967168  ;;  %p709_p4 = scmp.eq.s32.totalorder %s510_s13, 0 }
  0x53   : > { %448 = dma.done.wait (%p709_p4), [#allocation6], 128   ;;  %p710_p11 = pmov %p709_p4 }
  0x54   : > { %s171_s17 = scalar_lea.vmem [#allocation7], %s277_s25  ;;  %s281_s24 = sshll.u32 %s510_s13, 7  ;;  %v172_v0 = vld [vmem:[%s147_s28] sm:$0xff]  ;;  %v173_v1 = vld [vmem:[#allocation5] sm:$0xff] }
  0x55   : > { %450 = vsyncadd (%p710_p11), [#allocation6], 4294967168  ;;  %s190_s19 = sshll.u32 %s171_s17, 4  ;;  %v174_v2 = vadd.f32 %v173_v1, %v172_v0  ;;  %s648_s27 = scalar_lea.hbm %s692_s2, %s281_s24  ;;  %s643_s19 = int_to_ptr.vmem [resolvable:$true] %s190_s19 }
  0x56   : > { %s177_s29 = scalar_lea.sflag [#allocation4], %s630_s22  ;;  %s399_s30 = scalar_lea.vmem %s643_s19, 128 }
  0x57   : > { %175 = vst [vmem:[%s171_s17] sm:$0xff] %v174_v2  ;;  %p400_p6 = scmp.ne.s32.totalorder %s643_s19, %s399_s30  ;;  %s473_s13 = smov [#allocation7]  }
  0x58   : > { %s403_s3 = sshll.u32 %s473_s13, 4  ;;  %s404_s3 = int_to_ptr.vmem [resolvable:$false] %s403_s3 }
  0x59   : > { %p401_p9 = pnand %p400_p6, %p581_p8  ;;  %s405_s4 = scalar_lea.vmem %s404_s3, 256 }
  0x5a   : > { %p406_p13 = scmp.lt.s32.totalorder %s643_s19, %s404_s3  ;;  %p407_p0 = scmp.lt.s32.totalorder %s405_s4, %s399_s30 }
  0x5b   : > { %p402_p12 = pneg %p401_p9 }
  0x5c   : > { %p408_p5 = por %p407_p0, %p406_p13 }
  0x5e   : > { %p409_p10 = pnand %p408_p5, %p402_p12 }
  0x60   : > { %412 = shalt.err (!%p409_p10)
}
  0x61   : > { %s413_s5 = scalar_lea.hbm %s648_s27, 128  ;;  %s417_s18 = scalar_lea.hbm %s692_s2, 256 }
  0x62   : > { %p414_p1 = scmp.ne.s32.totalorder %s648_s27, %s413_s5  ;;  %p418_p3 = scmp.lt.u32.totalorder %s648_s27, %s692_s2 }
  0x63   : > { %p419_p4 = scmp.lt.u32.totalorder %s417_s18, %s413_s5  ;;  %p421_p6 = scmp.lt.u32.totalorder %s413_s5, %s648_s27 }
  0x64   : > { %p415_p2 = pnand %p414_p1, %p581_p8 }
  0x65   : > { %p420_p11 = por %p419_p4, %p418_p3 }
  0x66   : > { %p416_p7 = pneg %p415_p2 }
  0x67   : > { %p422_p9 = por %p421_p6, %p420_p11 }
  0x69   : > { %p423_p12 = pnand %p422_p9, %p416_p7 }
  0x6b   : > { %426 = shalt.err (!%p423_p12)
}
  0x6c   : > { %290 = dma.vmem_to_hbm [thread:$0]  (%p581_p8), %s643_s19, 128, %s648_s27, %s177_s29  }
  0x6d PF: > { %s202_s25 = sand.u32 1, %s457_s9   ;;  %p711_p13 = scmp.ne.s32.totalorder %s697_s16, 0 }
  0x6e   : > { %p712_p0 = scmp.ge.s32.totalorder %s469_s12, 2  ;;  %s203_s23 = scalar_lea.sflag [#allocation4], %s202_s25 }
  0x70   : > { %p301_p5 = pnand %p712_p0, %p711_p13 }
  0x72   : > { %452 = dma.done.wait (!%p301_p5), %s203_s23, 128  }
  0x73   : > { %454 = vsyncadd (!%p301_p5), %s203_s23, 4294967168  ;;  %p16_p10 = scmp.ge.s32.totalorder %s537_s20, 4   ;;  %s713_s9 = smov %s461_s10 }
  0x74   : > { %s714_s10 = smov %s465_s11  ;;  %s715_s11 = smov %s573_s7 }
  0x75   : > { %s716_s12 = smov %s537_s20  ;;  %18 = sbr.rel (!%p16_p10) target bundleno = 6 (0x6), region = 77 }
  0x7c   :  { %208 = vsyncpa [#allocation3], 1 }
  0x7d   :  { %210 = vsyncpa [#allocation3 + $0x1], 1 }
  0x7e   :  { %211 = vsyncpa [#allocation6], 1 }
  0x7f   :  { %212 = vsyncpa [#allocation4], 1 }
  0x80   :  { %214 = vsyncpa [#allocation4 + $0x1], 1 }

// kernel: tpu_custom_call.1
= control target key start
LH: loop header
LB: loop body
LE: loop exit
PB: predicated region body
PF: predicated region fallthrough
CT: control target
= control target key end

     0   :  { %10 = vsyncpa [#allocation4], 0  ;;  %s1638_s0 = inlined_call_operand.vmem [shape: f32[260,32], index: 0, kind: input, shape index: {}]   ;;  %s1639_s1 = inlined_call_operand.vmem [shape: bf16[32,128], index: 1, kind: input, shape index: {}]   ;;  %s1640_s2 = inlined_call_operand.vmem [shape: f32[1,128], index: 2, kind: input, shape index: {}]   ;;  %s1641_s3 = inlined_call_operand.vmem [shape: bf16[128,128], index: 3, kind: input, shape index: {}]   ;;  %s1642_s4 = inlined_call_operand.vmem [shape: f32[1,128], index: 4, kind: input, shape index: {}]   ;;  %s1643_s5 = inlined_call_operand.hbm [shape: f32[260,128], index: 5, kind: output, shape index: {}]  }
   0x1   :  { %12 = vsyncpa [#allocation4 + $0x1], 0  ;;  %s1325_s18 = smov 0   ;;  %s1327_s19 = smov 0  }
   0x2   :  { %s1329_s20 = smov 0   ;;  %s1331_s21 = smov 0  }
   0x3   :  { %s1333_s22 = smov 0   ;;  %s1335_s23 = smov 0  }
   0x4 LB: > { %s967_s24 = sadd.s32 4294967295, %s1288_s23   ;;  %s968_s25 = sadd.s32 4294967294, %s1288_s23   ;;  %s1288_s23 = sphi %s1335_s23, %s18_s23   ;;  %s1284_s22 = sphi %s1333_s22, %s1650_s22   ;;  %s1280_s21 = sphi %s1331_s21, %s1649_s21   ;;  %s1276_s20 = sphi %s1329_s20, %s1648_s20   ;;  %s1272_s19 = sphi %s1327_s19, %s1647_s19   ;;  %s1268_s18 = sphi %s1325_s18, %s1646_s18  }
   0x5   : > { %s30_s26 = sadd.s32 1, %s1284_s22  ;;  %s162_s27 = sadd.s32 1, %s1276_s20 }
   0x6   : > { %p32_p0 = scmp.ge.s32.totalorder %s30_s26, 2  ;;  %p172_p1 = scmp.ne.s32.totalorder %s1276_s20, %s1272_s19 }
   0x7   : > { %p173_p2 = scmp.eq.s32.totalorder %s967_s24, 1  ;;  %p178_p3 = scmp.ne.s32.totalorder %s1272_s19, %s1268_s18 }
   0x8   : > { %s1652_s26 = smov (%p32_p0, %s30_s26), 0  ;;  %p179_p5 = scmp.eq.s32.totalorder %s968_s25, 1 }
   0x9   : > { %p1365_p4 = por %p173_p2, %p172_p1  ;;  %s159_s29 = ssub.s32 %s1284_s22, %s1652_s26 }
   0xa   : > { %p974_p6 = scmp.ge.s32.totalorder %s1288_s23, 1  ;;  %p160_p7 = scmp.eq.s32.totalorder %s159_s29, 0 }
   0xb   : > { %p1372_p8 = por %p179_p5, %p178_p3  ;;  %p239_p9 = scmp.lt.s32.totalorder %s1288_s23, 3 }
   0xc   : > { %s1378_s6 = scalar_select %p160_p7, %s1276_s20, %s162_s27  }
   0xd   : > { %p240_p10 = pnand %p974_p6, %p239_p9 }
   0xe   : > { %v1200_v0 = vld [vmem:[%s1639_s1] sm:$0xff] (!%p240_p10)   ;;  %v1290_v1 = vmov (!%p240_p10), 0.0   ;;  %v1201_v2 = vld [vmem:[%s1639_s1 + $0x8] sm:$0xff] (!%p240_p10)   ;;  %vm1291_vm0 = vmmov (!%p240_p10), 0   ;;  %s1391_s11 = smul.u32 (!%p240_p10), 18, %s1280_s21  ;;  %vm388_vm1 = vcmask (!%p240_p10), 261120  }
   0xf   : > { %243 = sbr.rel (%p240_p10) target bundleno = 558 (0x22e), region = 40  ;;  %1033 = vmatprep.subr.bf16.mxu0 (!%p240_p10), %v1290_v1  ;;  %1125 = vmatprep.subr.bf16.mxu1 (!%p240_p10), %v1290_v1  ;;  %v1202_v3 = vld [vmem:[%s1641_s3] sm:$0xff] (!%p240_p10)   ;;  %v1203_v4 = vld [vmem:[%s1641_s3 + $0x8] sm:$0xff] (!%p240_p10)   ;;  %v1204_v8 = vld [vmem:[%s1641_s3 + $0x10] sm:$0xff] (!%p240_p10)   ;;  %s280_s29 = sand.u32 (!%p240_p10), 1, %s1272_s19  }
  0x10   : > { %1034 = vmatpush3.bf16.msra.mxu0 (!%p240_p10), %v1200_v0  ;;  %1037 = vmatprep.mubr.msk.bf16.mxu0 (!%p240_p10), %vm1291_vm0, %v1290_v1  ;;  %p288_p11 = scmp.lt.s32.totalorder (!%p240_p10), %s1391_s11, 32  ;;  %v1205_v11 = vld [vmem:[%s1641_s3 + $0x18] sm:$0xff] (!%p240_p10)   ;;  %v1206_v13 = vld [vmem:[%s1641_s3 + $0x20] sm:$0xff] (!%p240_p10)   ;;  %v1207_v16 = vld [vmem:[%s1641_s3 + $0x28] sm:$0xff] (!%p240_p10)   ;;  %s1141_s7 = smul.u32 (!%p240_p10), 144, %s280_s29 }
  0x11   : > { %1035 = vmatprep.subr.bf16.mxu0 (!%p240_p10), %v1290_v1  ;;  %1093 = vmatprep.mubr.msk.bf16.mxu1 (!%p240_p10), %vm1291_vm0, %v1290_v1  ;;  %v1208_v36 = vld [vmem:[%s1641_s3 + $0x30] sm:$0xff] (!%p240_p10)   ;;  %v1209_v37 = vld [vmem:[%s1641_s3 + $0x38] sm:$0xff] (!%p240_p10)   ;;  %v1490_v38 = vld [vmem:[%s1640_s2] ss:$0 sm:$0xff] (!%p240_p10)  ;;  %s1572_s12 = scalar_lea.sflag (!%p240_p10), [#allocation4], %s280_s29 }
  0x12   : > { %1133 = vmatpush3.bf16.msra.mxu1 (!%p240_p10), %v1202_v3  ;;  %s1533_s10 = scalar_lea.vmem (!%p240_p10), [#allocation3], %s1141_s7 }
  0x13   : > { %1126 = vmatprep.subr.bf16.mxu1 (!%p240_p10), %v1290_v1 }
  0x14   : > { %1036 = vmatpush3.bf16.msra.mxu0 (!%p240_p10), %v1201_v2 }
  0x15   : > { %1073 = vmatprep.subr.bf16.mxu0 (!%p240_p10), %v1290_v1 }
  0x16   : > { %s289_s14 = scalar_select %p288_p11, %s1391_s11, 32  ;;  %1134 = vmatpush3.bf16.msra.mxu1 %v1203_v4 }
  0x17   : > { %1127 = vmatprep.subr.bf16.mxu1 %v1290_v1  ;;  %s844_s13 = ssub.s32 (%p1365_p4), 33, %s1391_s11 }
  0x18   : > { %s975_s17 = sshll.u32 %s289_s14, 3  ;;  %p845_p12 = scmp.lt.s32.totalorder (%p1365_p4), %s844_s13, 18 }
  0x19   : > { %s1409_s27 = scalar_lea.vmem %s1638_s0, %s975_s17 }
  0x1a   : > { %v338_v5 = vld [vmem:[%s1409_s27] sm:$0xff]  ;;  %v339_v6 = vld [vmem:[%s1409_s27 + $0x8] sm:$0xff]  ;;  %1135 = vmatpush3.bf16.msra.mxu1 %v1204_v8  ;;  %v340_v9 = vld [vmem:[%s1409_s27 + $0x10] sm:$0xff] }
  0x1b   : > { %v356_v7 = vpack.c.bf16 %v339_v6, %v338_v5  ;;  %v341_v10 = vld [vmem:[%s1409_s27 + $0x18] sm:$0xff]  ;;  %1128 = vmatprep.subr.bf16.mxu1 %v1290_v1  ;;  %v342_v14 = vld [vmem:[%s1409_s27 + $0x20] sm:$0xff]  ;;  %v343_v15 = vld [vmem:[%s1409_s27 + $0x28] sm:$0xff] }
  0x1c   : > { %v357_v12 = vpack.c.bf16 %v341_v10, %v340_v9  ;;  %v358_v17 = vpack.c.bf16 %v343_v15, %v342_v14  ;;  %v344_v18 = vld [vmem:[%s1409_s27 + $0x30] sm:$0xff]  ;;  %v345_v19 = vld [vmem:[%s1409_s27 + $0x38] sm:$0xff]  ;;  %v346_v21 = vld [vmem:[%s1409_s27 + $0x40] sm:$0xff] }
  0x1d   : > { %1038 = vmatmul.mubr.msk.bf16.vlgmr.msra.gmra.mrb[0].mxu0 %vm388_vm1, %v356_v7  ;;  %v359_v20 = vpack.c.bf16 %v345_v19, %v344_v18  ;;  %v347_v22 = vld [vmem:[%s1409_s27 + $0x48] sm:$0xff]  ;;  %v348_v24 = vld [vmem:[%s1409_s27 + $0x50] sm:$0xff]  ;;  %v349_v25 = vld [vmem:[%s1409_s27 + $0x58] sm:$0xff] }
  0x1e   : > { %1041 = vmatprep.mubr.msk.bf16.mxu0 %vm1291_vm0, %v1290_v1  ;;  %1074 = vmatpush3.bf16.msra.mxu0 %v1202_v3  ;;  %v360_v23 = vpack.c.bf16 %v347_v22, %v346_v21  ;;  %v361_v26 = vpack.c.bf16 %v349_v25, %v348_v24  ;;  %v350_v27 = vld [vmem:[%s1409_s27 + $0x60] sm:$0xff]  ;;  %v351_v28 = vld [vmem:[%s1409_s27 + $0x68] sm:$0xff]  ;;  %v352_v30 = vld [vmem:[%s1409_s27 + $0x70] sm:$0xff] }
  0x1f   : > { %1075 = vmatprep.subr.bf16.mxu0 %v1290_v1  ;;  %1136 = vmatpush3.bf16.msra.mxu1 %v1205_v11  ;;  %v362_v29 = vpack.c.bf16 %v351_v28, %v350_v27  ;;  %v353_v31 = vld [vmem:[%s1409_s27 + $0x78] sm:$0xff]  ;;  %v354_v33 = vld [vmem:[%s1409_s27 + $0x80] sm:$0xff]  ;;  %v355_v34 = vld [vmem:[%s1409_s27 + $0x88] sm:$0xff] }
  0x20   : > { %1129 = vmatprep.subr.bf16.mxu1 %v1290_v1  ;;  %v363_v32 = vpack.c.bf16 %v353_v31, %v352_v30  ;;  %v364_v35 = vpack.c.bf16 %v355_v34, %v354_v33 }
  0x22   : > { %1076 = vmatpush3.bf16.msra.mxu0 %v1203_v4 }
  0x23   : > { %1077 = vmatprep.subr.bf16.mxu0 %v1290_v1  ;;  %1137 = vmatpush3.bf16.msra.mxu1 %v1206_v13 }
  0x24   : > { %1130 = vmatprep.subr.bf16.mxu1 %v1290_v1 }
  0x25   : > { %1042 = vmatmul.mubr.msk.bf16.gmra.mrb[4].mxu0 %vm388_vm1, %v357_v12 }
  0x26   : > { %1045 = vmatprep.mubr.msk.bf16.mxu0 %vm1291_vm0, %v1290_v1  ;;  %1078 = vmatpush3.bf16.msra.mxu0 %v1204_v8 }
  0x27   : > { %1079 = vmatprep.subr.bf16.mxu0 %v1290_v1  ;;  %1138 = vmatpush3.bf16.msra.mxu1 %v1207_v16 }
  0x28   : > { %1131 = vmatprep.subr.bf16.mxu1 %v1290_v1 }
  0x2a   : > { %1080 = vmatpush3.bf16.msra.mxu0 %v1205_v11 }
  0x2b   : > { %1081 = vmatprep.subr.bf16.mxu0 %v1290_v1  ;;  %1139 = vmatpush3.bf16.msra.mxu1 %v1208_v36 }
  0x2c   : > { %1132 = vmatprep.subr.bf16.mxu1 %v1290_v1 }
  0x2d   : > { %1046 = vmatmul.mubr.msk.bf16.gmra.mrb[8].mxu0 %vm388_vm1, %v358_v17 }
  0x2e   : > { %1049 = vmatprep.mubr.msk.bf16.mxu0 %vm1291_vm0, %v1290_v1  ;;  %1082 = vmatpush3.bf16.msra.mxu0 %v1206_v13 }
  0x2f   : > { %1083 = vmatprep.subr.bf16.mxu0 %v1290_v1  ;;  %1140 = vmatpush3.bf16.msra.mxu1 %v1209_v37 }
  0x32   : > { %1084 = vmatpush3.bf16.msra.mxu0 %v1207_v16 }
  0x33   : > { %1085 = vmatprep.subr.bf16.mxu0 %v1290_v1 }
  0x35   : > { %1050 = vmatmul.mubr.msk.bf16.gmra.mrb[12].mxu0 %vm388_vm1, %v359_v20 }
  0x36   : > { %1053 = vmatprep.mubr.msk.bf16.mxu0 %vm1291_vm0, %v1290_v1  ;;  %1086 = vmatpush3.bf16.msra.mxu0 %v1208_v36 }
  0x37   : > { %1087 = vmatprep.subr.bf16.mxu0 %v1290_v1 }
  0x3a   : > { %1088 = vmatpush3.bf16.msra.mxu0 %v1209_v37 }
  0x3d   : > { %1054 = vmatmul.mubr.msk.bf16.gmra.mrb[16].mxu0 %vm388_vm1, %v360_v23 }
  0x3e   : > { %1057 = vmatprep.mubr.msk.bf16.mxu0 %vm1291_vm0, %v1290_v1 }
  0x45   : > { %1058 = vmatmul.mubr.msk.bf16.gmra.mrb[20].mxu0 %vm388_vm1, %v361_v26 }
  0x46   : > { %1061 = vmatprep.mubr.msk.bf16.mxu0 %vm1291_vm0, %v1290_v1 }
  0x4d   : > { %1062 = vmatmul.mubr.msk.bf16.gmra.mrb[24].mxu0 %vm388_vm1, %v362_v29 }
  0x4e   : > { %1065 = vmatprep.mubr.msk.bf16.mxu0 %vm1291_vm0, %v1290_v1 }
  0x55   : > { %1066 = vmatmul.mubr.msk.bf16.gmra.mrb[28].mxu0 %vm388_vm1, %v363_v32 }
  0x56   : > { %1069 = vmatprep.mubr.msk.bf16.mxu0 %vm1291_vm0, %v1290_v1 }
  0x5d   : > { %1070 = vmatmul.mubr.msk.bf16.gmra.mrb[32].mxu0 %vm388_vm1, %v364_v35 }
  0x5e   : > { %1089 = vmatprep.mubr.msk.bf16.mxu0 %vm1291_vm0, %v1290_v1 }
  0xf0   : > { %v450_v39 = vpop.f32.mrb[0].mxu0 }
  0xf1   : > { %v451_v40 = vadd.f32 %v1490_v38, %v450_v39  ;;  %v1039_v41 = vpop.f32.mrb[1].mxu0 }
  0xf2   : > { %v453_v42 = vpop.f32.mrb[2].mxu0 }
  0xf3   : > { %v454_v43 = vadd.f32 %v1490_v38, %v453_v42  ;;  %v1040_v44 = vpop.f32.mrb[3].mxu0  ;;  %v521_v45 = vmax.f32 %v451_v40, 0.0 }
  0xf5   : > { %v522_v46 = vmax.f32 %v454_v43, 0.0 }
  0xf7   : > { %v557_v47 = vpack.c.bf16 %v522_v46, %v521_v45 }
  0xf8   : > { %v458_v48 = vpop.f32.mrb[4].mxu0 }
  0xf9   : > { %v459_v49 = vadd.f32 %v1490_v38, %v458_v48  ;;  %v1043_v50 = vpop.f32.mrb[5].mxu0  ;;  %1090 = vmatmul.mubr.bf16.vlgmr.msra.gmra.mrb[36].mxu0 %v557_v47 }
  0xfa   : > { %v461_v51 = vpop.f32.mrb[6].mxu0 }
  0xfb   : > { %v462_v52 = vadd.f32 %v1490_v38, %v461_v51  ;;  %v1044_v53 = vpop.f32.mrb[7].mxu0  ;;  %v523_v54 = vmax.f32 %v459_v49, 0.0 }
  0xfd   : > { %v524_v55 = vmax.f32 %v462_v52, 0.0 }
  0xff   : > { %v558_v56 = vpack.c.bf16 %v524_v55, %v523_v54 }
 0x100   : > { %v466_v57 = vpop.f32.mrb[8].mxu0 }
 0x101   : > { %v467_v58 = vadd.f32 %v1490_v38, %v466_v57  ;;  %v1047_v59 = vpop.f32.mrb[9].mxu0  ;;  %1094 = vmatmul.mubr.bf16.vlgmr.msra.gmra.mrb[0].mxu1 %v558_v56 }
 0x102   : > { %v469_v60 = vpop.f32.mrb[10].mxu0  ;;  %1097 = vmatprep.mubr.msk.bf16.mxu1 %vm1291_vm0, %v1290_v1 }
 0x103   : > { %v470_v61 = vadd.f32 %v1490_v38, %v469_v60  ;;  %v1048_v62 = vpop.f32.mrb[11].mxu0  ;;  %v525_v63 = vmax.f32 %v467_v58, 0.0  ;;  %v1530_v58 = vld [vmem:[%s1642_s4] ss:$0 sm:$0xff] }
 0x105   : > { %v526_v0 = vmax.f32 %v470_v61, 0.0 }
 0x107   : > { %v559_v2 = vpack.c.bf16 %v526_v0, %v525_v63 }
 0x108   : > { %v474_v3 = vpop.f32.mrb[12].mxu0 }
 0x109   : > { %v475_v4 = vadd.f32 %v1490_v38, %v474_v3  ;;  %v1051_v5 = vpop.f32.mrb[13].mxu0  ;;  %1098 = vmatmul.mubr.bf16.gmra.mrb[4].mxu1 %v559_v2 }
 0x10a   : > { %v477_v6 = vpop.f32.mrb[14].mxu0  ;;  %1101 = vmatprep.mubr.msk.bf16.mxu1 %vm1291_vm0, %v1290_v1 }
 0x10b   : > { %v478_v7 = vadd.f32 %v1490_v38, %v477_v6  ;;  %v1052_v8 = vpop.f32.mrb[15].mxu0  ;;  %v527_v9 = vmax.f32 %v475_v4, 0.0 }
 0x10d   : > { %v528_v10 = vmax.f32 %v478_v7, 0.0 }
 0x10f   : > { %v560_v11 = vpack.c.bf16 %v528_v10, %v527_v9 }
 0x110   : > { %v482_v12 = vpop.f32.mrb[16].mxu0 }
 0x111   : > { %v483_v13 = vadd.f32 %v1490_v38, %v482_v12  ;;  %v1055_v14 = vpop.f32.mrb[17].mxu0  ;;  %1102 = vmatmul.mubr.bf16.gmra.mrb[8].mxu1 %v560_v11 }
 0x112   : > { %v485_v15 = vpop.f32.mrb[18].mxu0  ;;  %1105 = vmatprep.mubr.msk.bf16.mxu1 %vm1291_vm0, %v1290_v1 }
 0x113   : > { %v486_v16 = vadd.f32 %v1490_v38, %v485_v15  ;;  %v1056_v17 = vpop.f32.mrb[19].mxu0  ;;  %v529_v18 = vmax.f32 %v483_v13, 0.0 }
 0x115   : > { %v530_v19 = vmax.f32 %v486_v16, 0.0 }
 0x117   : > { %v561_v20 = vpack.c.bf16 %v530_v19, %v529_v18 }
 0x118   : > { %v490_v21 = vpop.f32.mrb[20].mxu0 }
 0x119   : > { %v491_v22 = vadd.f32 %v1490_v38, %v490_v21  ;;  %v1059_v23 = vpop.f32.mrb[21].mxu0  ;;  %1106 = vmatmul.mubr.bf16.gmra.mrb[12].mxu1 %v561_v20 }
 0x11a   : > { %v493_v24 = vpop.f32.mrb[22].mxu0  ;;  %1109 = vmatprep.mubr.msk.bf16.mxu1 %vm1291_vm0, %v1290_v1 }
 0x11b   : > { %v494_v25 = vadd.f32 %v1490_v38, %v493_v24  ;;  %v1060_v26 = vpop.f32.mrb[23].mxu0  ;;  %v531_v27 = vmax.f32 %v491_v22, 0.0 }
 0x11d   : > { %v532_v28 = vmax.f32 %v494_v25, 0.0 }
 0x11f   : > { %v562_v29 = vpack.c.bf16 %v532_v28, %v531_v27 }
 0x120   : > { %v498_v30 = vpop.f32.mrb[24].mxu0 }
 0x121   : > { %v499_v31 = vadd.f32 %v1490_v38, %v498_v30  ;;  %v1063_v32 = vpop.f32.mrb[25].mxu0  ;;  %1110 = vmatmul.mubr.bf16.gmra.mrb[16].mxu1 %v562_v29 }
 0x122   : > { %v501_v33 = vpop.f32.mrb[26].mxu0  ;;  %1113 = vmatprep.mubr.msk.bf16.mxu1 %vm1291_vm0, %v1290_v1 }
 0x123   : > { %v502_v34 = vadd.f32 %v1490_v38, %v501_v33  ;;  %v1064_v35 = vpop.f32.mrb[27].mxu0  ;;  %v533_v36 = vmax.f32 %v499_v31, 0.0 }
 0x125   : > { %v534_v37 = vmax.f32 %v502_v34, 0.0 }
 0x127   : > { %v563_v39 = vpack.c.bf16 %v534_v37, %v533_v36 }
 0x128   : > { %v506_v40 = vpop.f32.mrb[28].mxu0 }
 0x129   : > { %v507_v41 = vadd.f32 %v1490_v38, %v506_v40  ;;  %v1067_v42 = vpop.f32.mrb[29].mxu0  ;;  %1114 = vmatmul.mubr.bf16.gmra.mrb[20].mxu1 %v563_v39 }
 0x12a   : > { %v509_v43 = vpop.f32.mrb[30].mxu0  ;;  %1117 = vmatprep.mubr.msk.bf16.mxu1 %vm1291_vm0, %v1290_v1 }
 0x12b   : > { %v510_v44 = vadd.f32 %v1490_v38, %v509_v43  ;;  %v1068_v45 = vpop.f32.mrb[31].mxu0  ;;  %v535_v46 = vmax.f32 %v507_v41, 0.0 }
 0x12d   : > { %v536_v47 = vmax.f32 %v510_v44, 0.0 }
 0x12f   : > { %v564_v48 = vpack.c.bf16 %v536_v47, %v535_v46 }
 0x130   : > { %v514_v49 = vpop.f32.mrb[32].mxu0 }
 0x131   : > { %v515_v50 = vadd.f32 %v1490_v38, %v514_v49  ;;  %v1071_v51 = vpop.f32.mrb[33].mxu0  ;;  %1118 = vmatmul.mubr.bf16.gmra.mrb[24].mxu1 %v564_v48 }
 0x132   : > { %v517_v52 = vpop.f32.mrb[34].mxu0  ;;  %1121 = vmatprep.mubr.msk.bf16.mxu1 %vm1291_vm0, %v1290_v1 }
 0x133   : > { %v518_v53 = vadd.f32 %v1490_v38, %v517_v52  ;;  %v1072_v54 = vpop.f32.mrb[35].mxu0  ;;  %v537_v55 = vmax.f32 %v515_v50, 0.0 }
 0x135   : > { %v538_v56 = vmax.f32 %v518_v53, 0.0 }
 0x137   : > { %v565_v57 = vpack.c.bf16 %v538_v56, %v537_v55 }
 0x139   : > { %1122 = vmatmul.mubr.bf16.gmra.mrb[28].mxu1 %v565_v57 }
 0x1cc   : > { %v664_v59 = vpop.f32.mrb[36].mxu0 }
 0x1cd   : > { %v799_v60 = vadd.f32 %v1530_v58, %v664_v59  ;;  %v1091_v61 = vpop.f32.mrb[37].mxu0 }
 0x1ce   : > { %v667_v1 = vpop.f32.mrb[38].mxu0 }
 0x1cf   : > { %817 = vst [vmem:[%s1533_s10] sm:$0xff] %v799_v60  ;;  %v800_v38 = vadd.f32 %v1530_v58, %v667_v1  ;;  %v1092_v62 = vpop.f32.mrb[39].mxu0 }
 0x1d1   : > { %818 = vst [vmem:[%s1533_s10 + $0x8] sm:$0xff] %v800_v38 }
 0x1d4   : > { %v672_v63 = vpop.f32.mrb[0].mxu1 }
 0x1d5   : > { %v801_v0 = vadd.f32 %v1530_v58, %v672_v63  ;;  %v1095_v2 = vpop.f32.mrb[1].mxu1 }
 0x1d6   : > { %v675_v3 = vpop.f32.mrb[2].mxu1 }
 0x1d7   : > { %819 = vst [vmem:[%s1533_s10 + $0x10] sm:$0xff] %v801_v0  ;;  %v802_v4 = vadd.f32 %v1530_v58, %v675_v3  ;;  %v1096_v5 = vpop.f32.mrb[3].mxu1 }
 0x1d9   : > { %820 = vst [vmem:[%s1533_s10 + $0x18] sm:$0xff] %v802_v4 }
 0x1dc   : > { %v680_v6 = vpop.f32.mrb[4].mxu1 }
 0x1dd   : > { %v803_v7 = vadd.f32 %v1530_v58, %v680_v6  ;;  %v1099_v8 = vpop.f32.mrb[5].mxu1 }
 0x1de   : > { %v683_v9 = vpop.f32.mrb[6].mxu1 }
 0x1df   : > { %821 = vst [vmem:[%s1533_s10 + $0x20] sm:$0xff] %v803_v7  ;;  %v804_v10 = vadd.f32 %v1530_v58, %v683_v9  ;;  %v1100_v11 = vpop.f32.mrb[7].mxu1 }
 0x1e1   : > { %822 = vst [vmem:[%s1533_s10 + $0x28] sm:$0xff] %v804_v10 }
 0x1e4   : > { %v688_v12 = vpop.f32.mrb[8].mxu1 }
 0x1e5   : > { %v805_v13 = vadd.f32 %v1530_v58, %v688_v12  ;;  %v1103_v14 = vpop.f32.mrb[9].mxu1 }
 0x1e6   : > { %v691_v15 = vpop.f32.mrb[10].mxu1 }
 0x1e7   : > { %823 = vst [vmem:[%s1533_s10 + $0x30] sm:$0xff] %v805_v13  ;;  %v806_v16 = vadd.f32 %v1530_v58, %v691_v15  ;;  %v1104_v17 = vpop.f32.mrb[11].mxu1 }
 0x1e9   : > { %824 = vst [vmem:[%s1533_s10 + $0x38] sm:$0xff] %v806_v16 }
 0x1ec   : > { %v696_v18 = vpop.f32.mrb[12].mxu1 }
 0x1ed   : > { %v807_v19 = vadd.f32 %v1530_v58, %v696_v18  ;;  %v1107_v20 = vpop.f32.mrb[13].mxu1 }
 0x1ee   : > { %v699_v21 = vpop.f32.mrb[14].mxu1 }
 0x1ef   : > { %825 = vst [vmem:[%s1533_s10 + $0x40] sm:$0xff] %v807_v19  ;;  %v808_v22 = vadd.f32 %v1530_v58, %v699_v21  ;;  %v1108_v23 = vpop.f32.mrb[15].mxu1 }
 0x1f1   : > { %826 = vst [vmem:[%s1533_s10 + $0x48] sm:$0xff] %v808_v22 }
 0x1f4   : > { %v704_v24 = vpop.f32.mrb[16].mxu1 }
 0x1f5   : > { %v809_v25 = vadd.f32 %v1530_v58, %v704_v24  ;;  %v1111_v26 = vpop.f32.mrb[17].mxu1 }
 0x1f6   : > { %v707_v27 = vpop.f32.mrb[18].mxu1 }
 0x1f7   : > { %827 = vst [vmem:[%s1533_s10 + $0x50] sm:$0xff] %v809_v25  ;;  %v810_v28 = vadd.f32 %v1530_v58, %v707_v27  ;;  %v1112_v29 = vpop.f32.mrb[19].mxu1 }
 0x1f9   : > { %828 = vst [vmem:[%s1533_s10 + $0x58] sm:$0xff] %v810_v28 }
 0x1fc   : > { %v712_v30 = vpop.f32.mrb[20].mxu1 }
 0x1fd   : > { %v811_v31 = vadd.f32 %v1530_v58, %v712_v30  ;;  %v1115_v32 = vpop.f32.mrb[21].mxu1 }
 0x1fe   : > { %v715_v33 = vpop.f32.mrb[22].mxu1 }
 0x1ff   : > { %829 = vst [vmem:[%s1533_s10 + $0x60] sm:$0xff] %v811_v31  ;;  %v812_v34 = vadd.f32 %v1530_v58, %v715_v33  ;;  %v1116_v35 = vpop.f32.mrb[23].mxu1 }
 0x201   : > { %830 = vst [vmem:[%s1533_s10 + $0x68] sm:$0xff] %v812_v34 }
 0x204   : > { %v720_v36 = vpop.f32.mrb[24].mxu1 }
 0x205   : > { %v813_v37 = vadd.f32 %v1530_v58, %v720_v36  ;;  %v1119_v39 = vpop.f32.mrb[25].mxu1 }
 0x206   : > { %v723_v40 = vpop.f32.mrb[26].mxu1 }
 0x207   : > { %831 = vst [vmem:[%s1533_s10 + $0x70] sm:$0xff] %v813_v37  ;;  %v814_v41 = vadd.f32 %v1530_v58, %v723_v40  ;;  %v1120_v42 = vpop.f32.mrb[27].mxu1 }
 0x209   : > { %832 = vst [vmem:[%s1533_s10 + $0x78] sm:$0xff] %v814_v41 }
 0x20b   : > { %842 = sbr.rel (!%p1365_p4) target bundleno = 558 (0x22e), region = 52 }
 0x20c   : > { %v728_v43 = vpop.f32.mrb[28].mxu1 }
 0x20d   : > { %v815_v44 = vadd.f32 %v1530_v58, %v728_v43  ;;  %v1123_v45 = vpop.f32.mrb[29].mxu1 }
 0x20e   : > { %v731_v46 = vpop.f32.mrb[30].mxu1 }
 0x20f   : > { %833 = vst [vmem:[%s1533_s10 + $0x80] sm:$0xff] %v815_v44  ;;  %v816_v47 = vadd.f32 %v1530_v58, %v731_v46  ;;  %v1124_v48 = vpop.f32.mrb[31].mxu1 }
 0x211   : > { %834 = vst [vmem:[%s1533_s10 + $0x88] sm:$0xff] %v816_v47 }
 0x212   : > { %s1654_s13 = smov (!%p845_p12, %s844_s13), 18 }
 0x213   : > { %s1577_s14 = sshll.u32 %s1654_s13, 7 }
 0x214   : > { %s849_s15 = ssub.s32 2304, %s1577_s14 }
 0x215   : > { %850 = vsyncadd %s1572_s12, %s849_s15  ;;  %p998_p13 = scmp.ne.s32.totalorder %s1577_s14, 0  ;;  %s1004_s16 = smul.u32 2304, %s1280_s21 }
 0x216   : > { %s855_s17 = sshll.u32 %s1533_s10, 4  ;;  %s1292_s27 = smov [#allocation3]   ;;  %s1589_s17 = int_to_ptr.vmem [resolvable:$true] %s855_s17 }
 0x217   : > { %s1587_s25 = scalar_lea.hbm %s1643_s5, %s1004_s16  ;;  %s1210_s11 = scalar_lea.vmem %s1589_s17, %s1577_s14 }
 0x218   : > { %p1211_p0 = scmp.ne.s32.totalorder %s1589_s17, %s1210_s11  ;;  %s1214_s29 = sshll.u32 %s1292_s27, 4  ;;  %s1215_s29 = int_to_ptr.vmem [resolvable:$false] %s1214_s29 }
 0x219   : > { %s1216_s21 = scalar_lea.vmem %s1215_s29, 4608  ;;  %p1217_p3 = scmp.lt.s32.totalorder %s1589_s17, %s1215_s29 }
 0x21a   : > { %p1212_p1 = pnand %p1211_p0, %p998_p13  ;;  %p1218_p4 = scmp.lt.s32.totalorder %s1216_s21, %s1210_s11 }
 0x21c   : > { %p1213_p2 = pneg %p1212_p1  ;;  %p1219_p5 = por %p1218_p4, %p1217_p3 }
 0x21e   : > { %p1220_p6 = pnand %p1219_p5, %p1213_p2 }
 0x220   : > { %1223 = shalt.err (!%p1220_p6)
}
 0x221   : > { %s1224_s7 = scalar_lea.hbm %s1587_s25, %s1577_s14  ;;  %s1228_s10 = scalar_lea.hbm %s1643_s5, 4224 }
 0x222   : > { %p1225_p7 = scmp.ne.s32.totalorder %s1587_s25, %s1224_s7  ;;  %p1229_p11 = scmp.lt.u32.totalorder %s1587_s25, %s1643_s5 }
 0x223   : > { %p1230_p12 = scmp.lt.u32.totalorder %s1228_s10, %s1224_s7  ;;  %p1232_p1 = scmp.lt.u32.totalorder %s1224_s7, %s1587_s25 }
 0x224   : > { %p1226_p9 = pnand %p1225_p7, %p998_p13 }
 0x225   : > { %p1231_p0 = por %p1230_p12, %p1229_p11 }
 0x226   : > { %p1227_p10 = pneg %p1226_p9 }
 0x227   : > { %p1233_p2 = por %p1232_p1, %p1231_p0 }
 0x229   : > { %p1234_p3 = pnand %p1233_p2, %p1227_p10 }
 0x22b   : > { %1237 = shalt.err (!%p1234_p3)
}
 0x22c   : > { %s1293_s16 = smov 128   ;;  %s1294_s28 = smov 8  }
 0x22d   : > { %861 = dma.vmem_to_hbm [thread:$0]  (%p998_p13), %s1589_s17, %s1577_s14, %s1587_s25, %s1572_s12, %s1293_s16, %s1293_s16, %s1294_s28  }
 0x22e PF: > { %p1147_p4 = scmp.ge.s32.totalorder %s1288_s23, 2  ;;  %s870_s24 = sand.u32 1, %s1268_s18  }
 0x22f   : > { %s871_s11 = scalar_lea.sflag [#allocation4], %s870_s24 }
 0x230   : > { %p1144_p5 = pnand %p1147_p4, %p1372_p8 }
 0x232   : > { %1263 = dma.done.wait (!%p1144_p5), %s871_s11, 2304  }
 0x233   : > { %1265 = vsyncadd (!%p1144_p5), %s871_s11, 4294964992  ;;  %s18_s23 = sadd.s32 1, %s1288_s23   ;;  %s1646_s18 = smov %s1272_s19 }
 0x234   : > { %p15_p6 = scmp.ge.s32.totalorder %s18_s23, 4   ;;  %s1647_s19 = smov %s1276_s20 }
 0x235   : > { %s1648_s20 = smov %s1378_s6  ;;  %s1649_s21 = smov %s1284_s22 }
 0x236   : > { %s1650_s22 = smov %s1652_s26  ;;  %17 = sbr.rel (!%p15_p6) target bundleno = 4 (0x4), region = 92 }
 0x23d   :  { %876 = vsyncpa [#allocation4], 1 }
 0x23e   :  { %878 = vsyncpa [#allocation4 + $0x1], 1 }

</bundles_post_ra>
